<compile_context>
chip_gen: v7x
topology: tpu7x:2x2x1
jax: 0.10.0
libtpu: 0.0.40
codegen_flags: <defaults>
</compile_context>

<pallas_src>
import numpy as np
import jax
import jax.numpy as jnp
from jax.experimental import pallas as pl
from jax.experimental.pallas import tpu as pltpu


_IN_TILE_BUDGET = 6 * 1024 * 1024      # bytes per (tH, 3*tW) f32 input block
_IN_TILE_HARD_CAP = 24 * 1024 * 1024   # beyond this, double-buffering risks VMEM
_LANE_CAP = 2048                       # max pixels per W tile


def _largest_divisor_leq(n: int, cap: int) -> int:
    for d in range(min(n, cap), 0, -1):
        if n % d == 0:
            return d
    return 1


def _pick_tiles(N: int, H: int, W: int):
    """Choose (tH, tW) pixel tiles.

    Legality ((8,128) rule on both the (tH, 3*tW) input block and the
    (tH/2, tW/2) output blocks):
      * tW multiple of 256 (=> 3*tW % 128 == 0 and tW/2 % 128 == 0) or tW == W
      * tH multiple of 16  (=> tH % 8 == 0 and tH/2 % 8 == 0)        or tH == H
    """
    # Lane (W) tile: largest multiple-of-256 divisor of W under the cap;
    # the full width is the always-legal fallback.
    cands_w = [c for c in range(256, min(W, _LANE_CAP) + 1, 256) if W % c == 0]
    tW = max(cands_w) if cands_w else W

    # Sublane (H) tile: largest multiple-of-16 divisor of H whose f32 input
    # block fits the budget; degrade to the smallest such divisor rather than
    # jumping to full H when the budget is exceeded.
    row_bytes = 3 * tW * 4
    cands_h = [c for c in range(16, H + 1, 16) if H % c == 0]
    fitting = [c for c in cands_h if c * row_bytes <= _IN_TILE_BUDGET]
    if fitting:
        tH = max(fitting)
    elif cands_h:
        tH = min(cands_h)
    else:
        tH = H  # H has no multiple-of-16 divisor; full height is always legal.

    # v7x megacore: a single-step grid leaves one TensorCore idle.  For small
    # batches, split the H tile if the result stays a multiple of 16.
    if N == 1 and H // tH == 1 and W // tW == 1 and tH % 32 == 0 and tH > 32:
        tH //= 2

    if tH * row_bytes > _IN_TILE_HARD_CAP:
        # TODO(synk): shapes where H has no multiple-of-16 divisor AND W has no
        # multiple-of-256 divisor (e.g. 1920x1080) need padding to tile; fail
        # loudly instead of silently blowing VMEM.
        raise ValueError(
            f"chroma_subsampling: cannot tile H={H}, W={W} within VMEM "
            f"(need H % 16 == 0 or a multiple-of-256 divisor of W)")
    return tH, tW


def _build_b(lane_blk: int) -> np.ndarray:
    """(6*lane_blk, 2*lane_blk) de-interleave + 2-pixel pooling matrix.

    Input lanes are channel-interleaved pixels (c0 c1 c2 c0 c1 c2 ...).  Output
    column j (< lane_blk) is Cb of pooled pixel j: 0.25*(lane 6j+1 + lane 6j+4);
    column lane_blk + j is Cr: 0.25*(lane 6j+2 + lane 6j+5).
    """
    kblk = 6 * lane_blk
    b = np.zeros((kblk, 2 * lane_blk), np.float32)
    j = np.arange(lane_blk)
    b[6 * j + 1, j] = 0.25
    b[6 * j + 4, j] = 0.25
    b[6 * j + 2, lane_blk + j] = 0.25
    b[6 * j + 5, lane_blk + j] = 0.25
    return b


def _pool_kernel(x_ref, b_ref, cb_ref, cr_ref):
    # x_ref : (tH, 3*tW)        raw channel-interleaved row tile of x
    # b_ref : (6*lb, 2*lb)      constant de-interleave + pooling block
    # cb_ref, cr_ref : (tH//2, tW//2)
    th2, tw2 = cb_ref.shape
    kblk, two_lb = b_ref.shape
    lb = two_lb // 2
    b = b_ref[...]
    for s in range(tw2 // lb):          # static unroll over output lane slabs
        k0 = s * kblk
        # 2x2 row-pair sum on the VPU via two sublane-strided loads.
        rows = (x_ref[pl.ds(0, th2, stride=2), pl.ds(k0, kblk)]
                + x_ref[pl.ds(1, th2, stride=2), pl.ds(k0, kblk)])
        # Channel de-interleave + lane-pair pooling + 0.25 scale as one small
        # K-blocked MXU matmul with f32 accumulation.
        out = jnp.dot(rows, b, preferred_element_type=jnp.float32)
        cb_ref[:, pl.ds(s * lb, lb)] = out[:, :lb].astype(cb_ref.dtype)
        cr_ref[:, pl.ds(s * lb, lb)] = out[:, lb:].astype(cr_ref.dtype)


def chroma_subsampling(x: jax.Array):
    """x: (N, H, W, 3) float32.  Returns (y, cb, cr) matching _ChromaSubsampling."""
    N, H, W, C = x.shape
    assert C == 3
    # TODO(synk): PyTorch avg_pool2d silently floors odd H/W; odd sizes unsupported here.
    assert H % 2 == 0 and W % 2 == 0
    H2, W2 = H // 2, W // 2

    tH, tW = _pick_tiles(N, H, W)
    tH2, tW2 = tH // 2, tW // 2
    lane_blk = _largest_divisor_leq(tW2, 128)

    # Luma: plain strided slice, fused by XLA.  No transpose of x anywhere.
    # TODO(synk): emit Y from the kernel on v7x to reach the ~18 B/px floor.
    y = x[:, :, :, 0]

    # Free contiguous view: channel interleave folded into the lane dimension.
    x_flat = x.reshape(N, H, 3 * W)

    b = jnp.asarray(_build_b(lane_blk))

    tile_bytes = tH * 3 * tW * 4
    vmem_limit = min(max(int(2.5 * tile_bytes) + 12 * (1 << 20), 24 * (1 << 20)),
                     60 * (1 << 20))

    cb, cr = pl.pallas_call(
        _pool_kernel,
        out_shape=(jax.ShapeDtypeStruct((N, H2, W2), x.dtype),
                   jax.ShapeDtypeStruct((N, H2, W2), x.dtype)),
        grid_spec=pltpu.PrefetchScalarGridSpec(
            num_scalar_prefetch=0,
            grid=(N, H // tH, W // tW),
            in_specs=[
                pl.BlockSpec((None, tH, 3 * tW), lambda n, h, w: (n, h, w)),
                # Constant index_map: B is fetched once and reused every step.
                pl.BlockSpec((6 * lane_blk, 2 * lane_blk), lambda n, h, w: (0, 0)),
            ],
            out_specs=(
                pl.BlockSpec((None, tH2, tW2), lambda n, h, w: (n, h, w)),
                pl.BlockSpec((None, tH2, tW2), lambda n, h, w: (n, h, w)),
            ),
        ),
        compiler_params=pltpu.CompilerParams(
            dimension_semantics=("parallel", "parallel", "parallel"),
            vmem_limit_bytes=vmem_limit,
        ),
    )(x_flat, b)
    return y, cb, cr


def _reference(x):
    # Pure-JAX reference of the PyTorch forward.
    N, H, W, _ = x.shape
    y = x[:, :, :, 0]

    def pool(p):  # p: (N, H, W)
        return p.reshape(N, H // 2, 2, W // 2, 2).mean(axis=(2, 4))

    return y, pool(x[:, :, :, 1]), pool(x[:, :, :, 2])


def _check(x):
    y, cb, cr = jax.jit(chroma_subsampling)(x)
    jax.block_until_ready((y, cb, cr))
    y_r, cb_r, cr_r = _reference(x)
    np.testing.assert_allclose(np.asarray(y), np.asarray(y_r), rtol=1e-6, atol=1e-6)
    np.testing.assert_allclose(np.asarray(cb), np.asarray(cb_r), rtol=1e-5, atol=1e-6)
    np.testing.assert_allclose(np.asarray(cr), np.asarray(cr_r), rtol=1e-5, atol=1e-6)
    return y, cb, cr


if __name__ == "__main__":
    key = jax.random.PRNGKey(0)
    k0, k1 = jax.random.split(key)

    # Primary small example.
    x = jax.random.uniform(k0, (2, 16, 16, 3), dtype=jnp.float32)
    y, cb, cr = _check(x)
    assert y.shape == (2, 16, 16) and cb.shape == (2, 8, 8) and cr.shape == (2, 8, 8)

    # Exercises the K-blocked lane slabs (tW2 = 256 -> 2 slabs of 128) and the
    # N=1 megacore H-tile split (grid (1, 2, 1)).
    x2 = jax.random.uniform(k1, (1, 64, 512, 3), dtype=jnp.float32)
    _check(x2)

    print("KERNEL_OK")
</pallas_src>

<mosaic_0001>
module attributes {stable_mosaic.version = 11 : i64} {
  func.func @_pool_kernel(%arg0: i32, %arg1: i32, %arg2: i32, %arg3: memref<1x16x48xf32, #tpu.memory_space<vmem>>, %arg4: memref<48x16xf32, #tpu.memory_space<vmem>>, %arg5: memref<1x8x8xf32, #tpu.memory_space<vmem>>, %arg6: memref<1x8x8xf32, #tpu.memory_space<vmem>>) attributes {dimension_semantics = [#tpu.dimension_semantics<parallel>, #tpu.dimension_semantics<parallel>, #tpu.dimension_semantics<parallel>], iteration_bounds = array<i64: 2, 1, 1>, scalar_prefetch = 0 : i64, scratch_operands = 0 : i64, tpu.core_type = #tpu.core_type<tc>, window_params = [{transform_indices = @transform_0, window_bounds = array<i64: 1, 16, 48>}, {pipeline_mode = #tpu.pipeline_mode<synchronous>, transform_indices = @transform_1, window_bounds = array<i64: 48, 16>}, {transform_indices = @transform_2, window_bounds = array<i64: 1, 8, 8>}, {transform_indices = @transform_3, window_bounds = array<i64: 1, 8, 8>}]} {
    %c0 = arith.constant 0 : index
    %c0_0 = arith.constant 0 : index
    %0 = vector.load %arg4[%c0, %c0_0] : memref<48x16xf32, #tpu.memory_space<vmem>>, vector<48x16xf32>
    %c0_1 = arith.constant 0 : index
    %c0_2 = arith.constant 0 : index
    %c0_3 = arith.constant 0 : index
    %1 = tpu.strided_load %arg3[%c0_1, %c0_2, %c0_3] {strides = array<i32: 1, 2, 1>} : memref<1x16x48xf32, #tpu.memory_space<vmem>>, vector<1x8x48xf32>
    %2 = vector.shape_cast %1 : vector<1x8x48xf32> to vector<8x48xf32>
    %c0_4 = arith.constant 0 : index
    %c1 = arith.constant 1 : index
    %c0_5 = arith.constant 0 : index
    %3 = tpu.strided_load %arg3[%c0_4, %c1, %c0_5] {strides = array<i32: 1, 2, 1>} : memref<1x16x48xf32, #tpu.memory_space<vmem>>, vector<1x8x48xf32>
    %4 = vector.shape_cast %3 : vector<1x8x48xf32> to vector<8x48xf32>
    %5 = arith.addf %2, %4 : vector<8x48xf32>
    %cst = arith.constant dense<0.000000e+00> : vector<8x16xf32>
    %6 = tpu.matmul %5, %0, %cst {dimension_numbers = #tpu.dot_dimension_numbers<[1], [0], [0], [1], [0, 0, 1, 1], [], []>} : vector<8x48xf32>, vector<48x16xf32>, vector<8x16xf32> -> vector<8x16xf32>
    %7 = vector.extract_strided_slice %6 {offsets = [0, 0], sizes = [8, 8], strides = [1, 1]} : vector<8x16xf32> to vector<8x8xf32>
    %c0_6 = arith.constant 0 : index
    %c0_7 = arith.constant 0 : index
    %c0_8 = arith.constant 0 : index
    %8 = vector.load %arg5[%c0_6, %c0_7, %c0_8] : memref<1x8x8xf32, #tpu.memory_space<vmem>>, vector<1x8x8xf32>
    %9 = vector.shape_cast %8 : vector<1x8x8xf32> to vector<8x8xf32>
    %10 = vector.shape_cast %7 : vector<8x8xf32> to vector<1x8x8xf32>
    tpu.vector_store %arg5[%c0_6, %c0_7, %c0_8], %10 {strides = array<i32>} : memref<1x8x8xf32, #tpu.memory_space<vmem>>, vector<1x8x8xf32>,
    %11 = vector.extract_strided_slice %6 {offsets = [0, 8], sizes = [8, 8], strides = [1, 1]} : vector<8x16xf32> to vector<8x8xf32>
    %c0_9 = arith.constant 0 : index
    %c0_10 = arith.constant 0 : index
    %c0_11 = arith.constant 0 : index
    %12 = vector.load %arg6[%c0_9, %c0_10, %c0_11] : memref<1x8x8xf32, #tpu.memory_space<vmem>>, vector<1x8x8xf32>
    %13 = vector.shape_cast %12 : vector<1x8x8xf32> to vector<8x8xf32>
    %14 = vector.shape_cast %11 : vector<8x8xf32> to vector<1x8x8xf32>
    tpu.vector_store %arg6[%c0_9, %c0_10, %c0_11], %14 {strides = array<i32>} : memref<1x8x8xf32, #tpu.memory_space<vmem>>, vector<1x8x8xf32>,
    return
  }
  func.func @transform_0(%arg0: i32, %arg1: i32, %arg2: i32) -> (i32, i32, i32) {
    %c0_i32 = arith.constant 0 : i32
    return %arg0, %arg1, %arg2 : i32, i32, i32
  }
  func.func @transform_1(%arg0: i32, %arg1: i32, %arg2: i32) -> (i32, i32) {
    %c0_i32 = arith.constant 0 : i32
    %c0_i32_0 = arith.constant 0 : i32
    %c0_i32_1 = arith.constant 0 : i32
    return %c0_i32, %c0_i32_0 : i32, i32
  }
  func.func @transform_2(%arg0: i32, %arg1: i32, %arg2: i32) -> (i32, i32, i32) {
    %c0_i32 = arith.constant 0 : i32
    return %arg0, %arg1, %arg2 : i32, i32, i32
  }
  func.func @transform_3(%arg0: i32, %arg1: i32, %arg2: i32) -> (i32, i32, i32) {
    %c0_i32 = arith.constant 0 : i32
    return %arg0, %arg1, %arg2 : i32, i32, i32
  }
}

</mosaic_0001>

<bundles_post_ra>
// kernel: chroma_subsampling.1
= control target key start
LH: loop header
LB: loop body
LE: loop exit
PB: predicated region body
PF: predicated region fallthrough
CT: control target
= control target key end

     0   :  { %9 = vsyncpa [#allocation3], 0  ;;  %s900_s0 = inlined_call_operand.vmem [shape: f32[2,16,48], index: 0, kind: input, shape index: {}]   ;;  %s901_s1 = inlined_call_operand.vmem [shape: f32[48,16], index: 1, kind: input, shape index: {}]   ;;  %s902_s2 = inlined_call_operand.hbm [shape: f32[2,8,8], index: 2, kind: output, shape index: {0}]   ;;  %s903_s3 = inlined_call_operand.hbm [shape: f32[2,8,8], index: 3, kind: output, shape index: {1}]  }
   0x1   :  { %11 = vsyncpa [#allocation3 + $0x1], 0 }
   0x2   :  { %12 = vsyncpa [#allocation5], 0 }
   0x3   :  { %14 = vsyncpa [#allocation5 + $0x1], 0  ;;  %s727_s12 = smov 0   ;;  %s729_s13 = smov 0  }
   0x4   :  { %s731_s14 = smov 0   ;;  %s733_s15 = smov 0  }
   0x5   :  { %s735_s16 = smov 0   ;;  %s737_s17 = smov 0  }
   0x6 LB: > { %s476_s18 = sadd.s32 4294967295, %s699_s17   ;;  %s477_s19 = sadd.s32 4294967294, %s699_s17   ;;  %s699_s17 = sphi %s737_s17, %s20_s17   ;;  %s695_s16 = sphi %s735_s16, %s910_s16   ;;  %s691_s15 = sphi %s733_s15, %s909_s15   ;;  %s687_s14 = sphi %s731_s14, %s908_s14   ;;  %s683_s13 = sphi %s729_s13, %s907_s13   ;;  %s679_s12 = sphi %s727_s12, %s906_s12  }
   0x7   : > { %s39_s20 = sadd.s32 1, %s695_s16  ;;  %s101_s21 = sadd.s32 1, %s687_s14 }
   0x8   : > { %p41_p0 = scmp.ge.s32.totalorder %s39_s20, 2  ;;  %p111_p1 = scmp.ne.s32.totalorder %s687_s14, %s683_s13 }
   0x9   : > { %p112_p2 = scmp.eq.s32.totalorder %s476_s18, 1  ;;  %p117_p3 = scmp.ne.s32.totalorder %s683_s13, %s679_s12 }
   0xa   : > { %s912_s20 = smov (%p41_p0, %s39_s20), 0  ;;  %p118_p5 = scmp.eq.s32.totalorder %s477_s19, 1 }
   0xb   : > { %p767_p4 = por %p112_p2, %p111_p1  ;;  %s94_s23 = ssub.s32 %s695_s16, %s912_s20 }
   0xc   : > { %p480_p6 = scmp.ge.s32.totalorder %s699_s17, 1  ;;  %p99_p7 = scmp.eq.s32.totalorder %s94_s23, 0 }
   0xd   : > { %p774_p8 = por %p118_p5, %p117_p3  ;;  %p185_p9 = scmp.lt.s32.totalorder %s699_s17, 3 }
   0xe   : > { %s780_s25 = scalar_select %p99_p7, %s687_s14, %s101_s21  }
   0xf   : > { %p186_p10 = pnand %p480_p6, %p185_p9 }
  0x10   : > { %v234_v0 = vld [vmem:[%s901_s1] sm:$0xff] (!%p186_p10)  ;;  %v235_v1 = vld [vmem:[%s901_s1 + $0x8] sm:$0xff] (!%p186_p10)  ;;  %v236_v2 = vld [vmem:[%s901_s1 + $0x10] sm:$0xff] (!%p186_p10)  ;;  %v701_v3 = vmov (!%p186_p10), 0.0|0.0   ;;  %vm702_vm0 = vmmov (!%p186_p10), 0   ;;  %v703_v6 = vmov (!%p186_p10), 0.0  }
  0x11   : > { %189 = sbr.rel (%p186_p10) target bundleno = 372 (0x174), region = 28  ;;  %516 = vmatprep.subr.bf16.mxu0 (!%p186_p10), %v701_v3  ;;  %v517_v4 = vpack.c.bf16 (!%p186_p10), %v235_v1, %v234_v0  ;;  %v237_v5 = vld [vmem:[%s901_s1 + $0x18] sm:$0xff] (!%p186_p10)  ;;  %513 = vmatprep.mubr.msk.f32.mxu0 (!%p186_p10), %vm702_vm0, %v703_v6  ;;  %p222_p11 = scmp.lt.s32.totalorder (!%p186_p10), %s691_s15, 1  ;;  %v238_v8 = vld [vmem:[%s901_s1 + $0x20] sm:$0xff] (!%p186_p10)  ;;  %v239_v9 = vld [vmem:[%s901_s1 + $0x28] sm:$0xff] (!%p186_p10)  ;;  %vm244_vm1 = vcmask (!%p186_p10), 392192  }
  0x12   : > { %v520_v7 = vpack.c.bf16 (!%p186_p10), %v237_v5, %v236_v2  ;;  %v523_v10 = vpack.c.bf16 (!%p186_p10), %v239_v9, %v238_v8  ;;  %s806_s26 = sand.u32 (!%p186_p10), 1, %s683_s13   ;;  %s489_s28 = sshll.u32 (!%p186_p10), %s691_s15, 7  ;;  %vm318_vm2 = vcmask (!%p186_p10), 64512  }
  0x13   : > { %518 = vmatpush3.bf16.msra.mxu0 (!%p186_p10), %v517_v4  ;;  %s481_s27 = sshll.u32 (!%p186_p10), %s806_s26, 3  ;;  %s817_s6 = scalar_lea.hbm (!%p186_p10), %s902_s2, %s489_s28 }
  0x14   : > { %519 = vmatprep.subr.bf16.mxu0 (!%p186_p10), %v701_v3  ;;  %s213_s29 = scalar_lea.vmem (!%p186_p10), [#allocation2], %s481_s27  ;;  %s326_s8 = scalar_lea.sflag (!%p186_p10), [#allocation3], %s806_s26 }
  0x15   : > { %s346_s30 = sshll.u32 (!%p186_p10), %s213_s29, 4  ;;  %s705_s10 = smov (!%p186_p10), [#allocation2]   ;;  %s819_s30 = int_to_ptr.vmem [resolvable:$true] %s346_s30 }
  0x16   : > { %s589_s9 = scalar_lea.vmem (!%p186_p10), %s819_s30, 128  ;;  %s593_s11 = sshll.u32 (!%p186_p10), %s705_s10, 4  ;;  %s594_s11 = int_to_ptr.vmem [resolvable:$false] %s593_s11 }
  0x17   : > { %521 = vmatpush3.bf16.msra.mxu0 (!%p186_p10), %v520_v7  ;;  %p590_p12 = scmp.ne.s32.totalorder (!%p186_p10), %s819_s30, %s589_s9  ;;  %p596_p1 = scmp.lt.s32.totalorder (!%p186_p10), %s819_s30, %s594_s11 }
  0x18   : > { %s223_s7 = scalar_select %p222_p11, %s691_s15, 1  ;;  %522 = vmatprep.subr.bf16.mxu0 %v701_v3 }
  0x19   : > { %p591_p13 = pnand %p590_p12, %p767_p4 }
  0x1a   : > { %s493_s18 = sshll.u32 %s223_s7, 4  ;;  %s704_s7 = smov 120  }
  0x1b   : > { %s232_s23 = scalar_lea.vmem %s900_s0, %s493_s18  ;;  %524 = vmatpush3.bf16.msra.mxu0 %v523_v10  ;;  %p592_p0 = pneg %p591_p13 }
  0x1c   : > { %v240_v11 = vld [vmem:[%s232_s23] ss:$2 sm:$0xff]  ;;  %v485_v12 = vld [vmem:[%s232_s23 + $0x1] ss:$2 sm:$0xff]  ;;  %s595_s18 = scalar_lea.vmem %s594_s11, 256 }
  0x1d   : > { %v243_v13 = vadd.f32 %v485_v12, %v240_v11  ;;  %p597_p2 = scmp.lt.s32.totalorder %s595_s18, %s589_s9 }
  0x1f   : > { %514 = vmatmul.mubr.msk.f32.vlgmr.msra.gmra.mrb[0].mxu0 %vm244_vm1, %v243_v13  ;;  %p598_p3 = por %p597_p2, %p596_p1 }
  0x21   : > { %p599_p5 = pnand %p598_p3, %p592_p0 }
  0xf2   : > { %v314_v14 = vpop.f32.mrb[0].mxu0 }
  0xf3   : > { %319 = vst.msk [vmem:[%s213_s29] sm:$0xff] %vm318_vm2, %v314_v14  ;;  %v515_v15 = vpop.f32.mrb[1].mxu0  ;;  %321 = vrot.lane.b32.xlu0 %v314_v14, %s704_s7 }
  0xf4   : > { %602 = shalt.err (!%p599_p5)
}
  0xf5   : > { %s603_s19 = scalar_lea.hbm %s817_s6, 128  ;;  %s607_s29 = scalar_lea.hbm %s902_s2, 256 }
  0xf6   : > { %p604_p6 = scmp.ne.s32.totalorder %s817_s6, %s603_s19  ;;  %p608_p10 = scmp.lt.u32.totalorder %s817_s6, %s902_s2 }
  0xf7   : > { %p609_p11 = scmp.lt.u32.totalorder %s607_s29, %s603_s19  ;;  %p611_p13 = scmp.lt.u32.totalorder %s603_s19, %s817_s6 }
  0xf8   : > { %p605_p7 = pnand %p604_p6, %p767_p4 }
  0xf9   : > { %p610_p12 = por %p609_p11, %p608_p10 }
  0xfa   : > { %p606_p9 = pneg %p605_p7 }
  0xfb   : > { %p612_p0 = por %p611_p13, %p610_p12 }
  0xfd   : > { %p613_p1 = pnand %p612_p0, %p606_p9 }
  0xff   : > { %616 = shalt.err (!%p613_p1)
}
 0x100   : > { %525 = dma.vmem_to_hbm [thread:$0]  (%p767_p4), %s819_s30, 128, %s817_s6, %s326_s8  }
 0x101   : > { %s220_s7 = scalar_lea.vmem [#allocation4], %s481_s27  ;;  %s851_s18 = scalar_lea.hbm %s903_s3, %s489_s28 }
 0x102   : > { %s361_s9 = sshll.u32 %s220_s7, 4  ;;  %s331_s19 = scalar_lea.sflag [#allocation5], %s806_s26  ;;  %s853_s9 = int_to_ptr.vmem [resolvable:$true] %s361_s9 }
 0x103   : > { %s617_s21 = scalar_lea.vmem %s853_s9, 128  ;;  %s706_s15 = smov [#allocation4]  }
 0x104   : > { %p618_p2 = scmp.ne.s32.totalorder %s853_s9, %s617_s21  ;;  %s621_s27 = sshll.u32 %s706_s15, 4  ;;  %s622_s27 = int_to_ptr.vmem [resolvable:$false] %s621_s27 }
 0x105   : > { %s623_s30 = scalar_lea.vmem %s622_s27, 256  ;;  %p624_p6 = scmp.lt.s32.totalorder %s853_s9, %s622_s27 }
 0x106   : > { %p619_p3 = pnand %p618_p2, %p767_p4  ;;  %p625_p7 = scmp.lt.s32.totalorder %s623_s30, %s617_s21 }
 0x108   : > { %p620_p5 = pneg %p619_p3  ;;  %p626_p9 = por %p625_p7, %p624_p6 }
 0x10a   : > { %p627_p10 = pnand %p626_p9, %p620_p5 }
 0x165   : > { %v322_v16 = vpop.permute.xlu0 %321 }
 0x166   : > { %324 = vst.msk [vmem:[%s220_s7] sm:$0xff] %vm318_vm2, %v322_v16 }
 0x167   : > { %630 = shalt.err (!%p627_p10)
}
 0x168   : > { %s631_s26 = scalar_lea.hbm %s851_s18, 128  ;;  %s635_s8 = scalar_lea.hbm %s903_s3, 256 }
 0x169   : > { %p632_p11 = scmp.ne.s32.totalorder %s851_s18, %s631_s26  ;;  %p636_p0 = scmp.lt.u32.totalorder %s851_s18, %s903_s3 }
 0x16a   : > { %p637_p1 = scmp.lt.u32.totalorder %s635_s8, %s631_s26  ;;  %p639_p3 = scmp.lt.u32.totalorder %s631_s26, %s851_s18 }
 0x16b   : > { %p633_p12 = pnand %p632_p11, %p767_p4 }
 0x16c   : > { %p638_p2 = por %p637_p1, %p636_p0 }
 0x16d   : > { %p634_p13 = pneg %p633_p12 }
 0x16e   : > { %p640_p5 = por %p639_p3, %p638_p2 }
 0x170   : > { %p641_p6 = pnand %p640_p5, %p634_p13 }
 0x172   : > { %644 = shalt.err (!%p641_p6)
}
 0x173   : > { %526 = dma.vmem_to_hbm [thread:$0]  (%p767_p4), %s853_s9, 128, %s851_s18, %s331_s19  }
 0x174 PF: > { %p536_p7 = scmp.ge.s32.totalorder %s699_s17, 2  ;;  %s373_s4 = sand.u32 1, %s679_s12  }
 0x175   : > { %s374_s5 = scalar_lea.sflag [#allocation3], %s373_s4 }
 0x176   : > { %p530_p9 = pnand %p536_p7, %p774_p8 }
 0x178   : > { %670 = dma.done.wait (!%p530_p9), %s374_s5, 128  }
 0x179   : > { %672 = vsyncadd (!%p530_p9), %s374_s5, 4294967168  ;;  %s383_s7 = scalar_lea.sflag [#allocation5], %s373_s4 }
 0x17a   : > { %674 = dma.done.wait (!%p530_p9), %s383_s7, 128  }
 0x17b   : > { %676 = vsyncadd (!%p530_p9), %s383_s7, 4294967168  ;;  %s20_s17 = sadd.s32 1, %s699_s17   ;;  %s906_s12 = smov %s683_s13 }
 0x17c   : > { %p17_p10 = scmp.ge.s32.totalorder %s20_s17, 4   ;;  %s907_s13 = smov %s687_s14 }
 0x17d   : > { %s908_s14 = smov %s780_s25  ;;  %s909_s15 = smov %s695_s16 }
 0x17e   : > { %s910_s16 = smov %s912_s20  ;;  %19 = sbr.rel (!%p17_p10) target bundleno = 6 (0x6), region = 81 }
 0x185   :  { %388 = vsyncpa [#allocation3], 1 }
 0x186   :  { %390 = vsyncpa [#allocation3 + $0x1], 1 }
 0x187   :  { %391 = vsyncpa [#allocation5], 1 }
 0x188   :  { %393 = vsyncpa [#allocation5 + $0x1], 1 }

</bundles_post_ra>
